<compile_context>
chip_gen: v7x
topology: tpu7x:2x2x1
jax: 0.10.0
libtpu: 0.0.40
codegen_flags: <defaults>
</compile_context>

<pallas_src>
import jax
import jax.numpy as jnp
from jax.experimental import pallas as pl
from jax.experimental.pallas import tpu as pltpu

_LANE = 128
_DEFAULT_TILE_N = 2048          # samples per tile (lane axis); multiple of 128
_FAST_PATH_MAX_ELEMS = 16384    # below this, plain fused XLA beats a kernel launch


def _round_up(x: int, m: int) -> int:
    return (x + m - 1) // m * m


def _quantile_loss_kernel(pred_ref, target_ref, quant_ref, out_ref):
    # pred_ref:   (Q, TILE_N) native dtype  -- quantiles on sublanes, samples on lanes
    # target_ref: (1, TILE_N) native dtype  -- broadcasts over the quantile (sublane) axis
    # quant_ref:  (Q, 1)      f32           -- broadcasts over the sample (lane) axis
    # out_ref:    (Q, TILE_N) f32
    err = target_ref[...].astype(jnp.float32) - pred_ref[...].astype(jnp.float32)
    q = quant_ref[...]
    q_minus_1 = q - 1.0
    out_ref[...] = jnp.maximum(q_minus_1 * err, q * err)


def quantile_loss_pallas(pred: jax.Array, target: jax.Array, quantiles: jax.Array,
                         *, tile_n: int = _DEFAULT_TILE_N) -> jax.Array:
    """pred: (N, Q), target: (N,), quantiles: (Q,) -> (N, Q) f32 pinball losses."""
    n, nq = pred.shape

    # Lane-dense layout plumbing: samples on the 128-lane axis, pad N up to a
    # whole number of tiles (padded work is discarded after the kernel).
    tile_n = max(_LANE, _round_up(min(tile_n, _round_up(n, _LANE)), _LANE))
    n_pad = _round_up(n, tile_n)

    pred_t = jnp.transpose(pred)              # (Q, N), native dtype
    target_t = target.reshape(1, n)           # (1, N), native dtype
    if n_pad != n:
        pred_t = jnp.pad(pred_t, ((0, 0), (0, n_pad - n)))
        target_t = jnp.pad(target_t, ((0, 0), (0, n_pad - n)))
    quant2d = quantiles.astype(jnp.float32).reshape(nq, 1)   # (Q, 1)

    grid = (n_pad // tile_n,)
    out_t = pl.pallas_call(
        _quantile_loss_kernel,
        out_shape=jax.ShapeDtypeStruct((nq, n_pad), jnp.float32),
        grid_spec=pltpu.PrefetchScalarGridSpec(
            num_scalar_prefetch=0,
            grid=grid,
            in_specs=[
                pl.BlockSpec((nq, tile_n), lambda i: (0, i)),   # pred   (Q, TILE_N)
                pl.BlockSpec((1, tile_n), lambda i: (0, i)),    # target (1, TILE_N)
                pl.BlockSpec((nq, 1), lambda i: (0, 0)),        # quantiles (Q, 1), resident
            ],
            out_specs=pl.BlockSpec((nq, tile_n), lambda i: (0, i)),
        ),
        compiler_params=pltpu.CompilerParams(
            dimension_semantics=("parallel",),   # shards the N grid across v7x's 2 TCs
            vmem_limit_bytes=64 << 20,           # headroom for large TILE_N; fits v7x's 64 MiB
        ),
    )(pred_t, target_t, quant2d)

    out = jnp.transpose(out_t)                 # (N_pad, Q) f32
    if n_pad != n:
        out = out[:n]
    return out


def quantile_loss(pred: jax.Array, target: jax.Array, quantiles: jax.Array,
                  *, use_pallas=None) -> jax.Array:
    """Dispatch: tiny problems use plain fused XLA (kernel launch overhead dominates)."""
    n, nq = pred.shape
    if use_pallas is None:
        use_pallas = (n * nq) >= _FAST_PATH_MAX_ELEMS
    if not use_pallas:
        q = quantiles.astype(jnp.float32).reshape(1, nq)
        err = target.reshape(n, 1).astype(jnp.float32) - pred.astype(jnp.float32)
        return jnp.maximum((q - 1.0) * err, q * err)
    return quantile_loss_pallas(pred, target, quantiles)


class QuantileLossJAX:
    """JAX/Pallas port of fairchem QuantileLoss (forward only, reduction=None)."""

    def __init__(self, num_quantiles=None, quantiles=None):
        if num_quantiles is not None:
            self.quantiles = jnp.linspace(0.01, 0.99, num_quantiles, dtype=jnp.float32)
        elif quantiles is not None:
            self.quantiles = jnp.asarray(quantiles, dtype=jnp.float32)
        else:
            raise ValueError("QuantileLoss requires num_quantiles or quantiles")

    def __call__(self, pred, target, natoms=None, *, use_pallas=None):
        # natoms unused when reduction=None (matches the PyTorch forward).
        return quantile_loss(pred, target, self.quantiles, use_pallas=use_pallas)


if __name__ == "__main__":
    key = jax.random.PRNGKey(0)
    k_pred, k_tgt = jax.random.split(key)

    N, Q = 16, 8  # small: 16 samples, 8 quantiles
    pred = jax.random.normal(k_pred, (N, Q), dtype=jnp.float32)
    target = jax.random.normal(k_tgt, (N,), dtype=jnp.float32)
    natoms = jnp.ones((N,), dtype=jnp.int32)

    loss_mod = QuantileLossJAX(num_quantiles=Q)

    # Pure-JAX reference.
    q = loss_mod.quantiles[None, :]
    err = target[:, None] - pred
    ref = jnp.maximum((q - 1.0) * err, q * err)

    # Force the Pallas path so the kernel itself is exercised at this tiny size.
    out = loss_mod(pred, target, natoms, use_pallas=True)
    out = jax.block_until_ready(out)
    assert out.shape == (N, Q)
    assert out.dtype == jnp.float32
    assert jnp.allclose(out, ref, atol=1e-5), "pallas kernel mismatch vs reference"

    # bf16 inputs: loaded natively, upcast in-kernel, f32 losses out (torch promotion).
    out_bf16 = jax.block_until_ready(
        quantile_loss_pallas(pred.astype(jnp.bfloat16), target.astype(jnp.bfloat16),
                             loss_mod.quantiles))
    ref_bf16 = jnp.maximum(
        (q - 1.0) * (target.astype(jnp.bfloat16).astype(jnp.float32)[:, None]
                     - pred.astype(jnp.bfloat16).astype(jnp.float32)),
        q * (target.astype(jnp.bfloat16).astype(jnp.float32)[:, None]
             - pred.astype(jnp.bfloat16).astype(jnp.float32)))
    assert jnp.allclose(out_bf16, ref_bf16, atol=1e-5), "bf16-path mismatch vs reference"

    # Auto-dispatch (fast path) also matches.
    out_auto = jax.block_until_ready(loss_mod(pred, target, natoms))
    assert jnp.allclose(out_auto, ref, atol=1e-5), "fast-path mismatch vs reference"

    print("KERNEL_OK")
</pallas_src>

<mosaic_0001>
module attributes {stable_mosaic.version = 11 : i64} {
  func.func @_quantile_loss_kernel(%arg0: i32, %arg1: memref<8x128xf32, #tpu.memory_space<vmem>>, %arg2: memref<1x128xf32, #tpu.memory_space<vmem>>, %arg3: memref<8x1xf32, #tpu.memory_space<vmem>>, %arg4: memref<8x128xf32, #tpu.memory_space<vmem>>) attributes {dimension_semantics = [#tpu.dimension_semantics<parallel>], iteration_bounds = array<i64: 1>, scalar_prefetch = 0 : i64, scratch_operands = 0 : i64, tpu.core_type = #tpu.core_type<tc>, window_params = [{transform_indices = @transform_0, window_bounds = array<i64: 8, 128>}, {transform_indices = @transform_1, window_bounds = array<i64: 1, 128>}, {pipeline_mode = #tpu.pipeline_mode<synchronous>, transform_indices = @transform_2, window_bounds = array<i64: 8, 1>}, {transform_indices = @transform_3, window_bounds = array<i64: 8, 128>}]} {
    %c0 = arith.constant 0 : index
    %c0_0 = arith.constant 0 : index
    %0 = vector.load %arg2[%c0, %c0_0] : memref<1x128xf32, #tpu.memory_space<vmem>>, vector<1x128xf32>
    %c0_1 = arith.constant 0 : index
    %c0_2 = arith.constant 0 : index
    %1 = vector.load %arg1[%c0_1, %c0_2] : memref<8x128xf32, #tpu.memory_space<vmem>>, vector<8x128xf32>
    %2 = vector.broadcast %0 : vector<1x128xf32> to vector<8x128xf32>
    %3 = arith.subf %2, %1 : vector<8x128xf32>
    %c0_3 = arith.constant 0 : index
    %c0_4 = arith.constant 0 : index
    %4 = vector.load %arg3[%c0_3, %c0_4] : memref<8x1xf32, #tpu.memory_space<vmem>>, vector<8x1xf32>
    %cst = arith.constant 1.000000e+00 : f32
    %5 = vector.broadcast %cst : f32 to vector<8x1xf32>
    %6 = arith.subf %4, %5 : vector<8x1xf32>
    %7 = vector.broadcast %6 : vector<8x1xf32> to vector<8x128xf32>
    %8 = arith.mulf %7, %3 : vector<8x128xf32>
    %9 = vector.broadcast %4 : vector<8x1xf32> to vector<8x128xf32>
    %10 = arith.mulf %9, %3 : vector<8x128xf32>
    %11 = arith.maximumf %8, %10 : vector<8x128xf32>
    %c0_5 = arith.constant 0 : index
    %c0_6 = arith.constant 0 : index
    %12 = vector.load %arg4[%c0_5, %c0_6] : memref<8x128xf32, #tpu.memory_space<vmem>>, vector<8x128xf32>
    tpu.vector_store %arg4[%c0_5, %c0_6], %11 {strides = array<i32>} : memref<8x128xf32, #tpu.memory_space<vmem>>, vector<8x128xf32>,
    return
  }
  func.func @transform_0(%arg0: i32) -> (i32, i32) {
    %c0_i32 = arith.constant 0 : i32
    %c0_i32_0 = arith.constant 0 : i32
    return %c0_i32, %arg0 : i32, i32
  }
  func.func @transform_1(%arg0: i32) -> (i32, i32) {
    %c0_i32 = arith.constant 0 : i32
    %c0_i32_0 = arith.constant 0 : i32
    return %c0_i32, %arg0 : i32, i32
  }
  func.func @transform_2(%arg0: i32) -> (i32, i32) {
    %c0_i32 = arith.constant 0 : i32
    %c0_i32_0 = arith.constant 0 : i32
    %c0_i32_1 = arith.constant 0 : i32
    return %c0_i32, %c0_i32_0 : i32, i32
  }
  func.func @transform_3(%arg0: i32) -> (i32, i32) {
    %c0_i32 = arith.constant 0 : i32
    %c0_i32_0 = arith.constant 0 : i32
    return %c0_i32, %arg0 : i32, i32
  }
}

</mosaic_0001>

<bundles_post_ra>
// kernel: tpu_custom_call.1
= control target key start
LH: loop header
LB: loop body
LE: loop exit
PB: predicated region body
PF: predicated region fallthrough
CT: control target
= control target key end

     0   :  { %8 = vsyncpa [#allocation3], 0  ;;  %s266_s0 = inlined_call_operand.hbm [shape: f32[8,128], index: 0, kind: input, shape index: {}]   ;;  %s267_s1 = inlined_call_operand.hbm [shape: f32[1,128], index: 1, kind: input, shape index: {}]   ;;  %s268_s2 = inlined_call_operand.hbm [shape: f32[8,1], index: 2, kind: input, shape index: {}]   ;;  %s269_s3 = inlined_call_operand.hbm [shape: f32[8,128], index: 3, kind: output, shape index: {}]  }
   0x1   :  { %9 = vsyncpa [#allocation6], 0 }
   0x2   :  { %10 = vsyncpa [#allocation4], 0  ;;  %s193_s12 = smov [#allocation5]   ;;  %s194_s14 = smov [#allocation2]  }
   0x3   :  { %s27_s13 = sshll.u32 %s193_s12, 4  ;;  %s17_s15 = sshll.u32 %s194_s14, 4  ;;  %s28_s13 = int_to_ptr.vmem [resolvable:$true] %s27_s13  ;;  %s18_s15 = int_to_ptr.vmem [resolvable:$true] %s17_s15 }
   0x4   :  { %s99_s18 = scalar_lea.hbm %s267_s1, 16 }
   0x5   :  { %p100_p0 = scmp.ne.s32.totalorder %s267_s1, %s99_s18  ;;  %p103_p1 = scmp.lt.u32.totalorder %s99_s18, %s267_s1 }
   0x7   :  { %p105_p2 = pnand %p103_p1, %p100_p0 }
   0x9   :  { %108 = shalt.err (!%p105_p2)
}
   0xa   :  { %s109_s23 = scalar_lea.vmem %s28_s13, 16  ;;  %s113_s24 = scalar_lea.vmem %s28_s13, 32 }
   0xb   :  { %p110_p3 = scmp.ne.s32.totalorder %s28_s13, %s109_s23  ;;  %p114_p4 = scmp.lt.s32.totalorder %s28_s13, %s28_s13 }
   0xc   :  { %p115_p5 = scmp.lt.s32.totalorder %s113_s24, %s109_s23 }
   0xe   :  { %p116_p6 = por %p115_p5, %p114_p4 }
  0x10   :  { %p117_p7 = pnand %p116_p6, %p110_p3 }
  0x12   :  { %120 = shalt.err (!%p117_p7)
}
  0x13   :  { %30 = dma.hbm_to_vmem [thread:$0]  %s267_s1, 16, %s28_s13, [#allocation6]  }
  0x14   :  { %s121_s29 = scalar_lea.hbm %s266_s0, 128 }
  0x15   :  { %p122_p8 = scmp.ne.s32.totalorder %s266_s0, %s121_s29  ;;  %p125_p9 = scmp.lt.u32.totalorder %s121_s29, %s266_s0 }
  0x17   :  { %p127_p10 = pnand %p125_p9, %p122_p8 }
  0x19   :  { %130 = shalt.err (!%p127_p10)
}
  0x1a   :  { %s131_s7 = scalar_lea.vmem %s18_s15, 128  ;;  %p136_p12 = scmp.lt.s32.totalorder %s18_s15, %s18_s15 }
  0x1b   :  { %p132_p11 = scmp.ne.s32.totalorder %s18_s15, %s131_s7  ;;  %p137_p13 = scmp.lt.s32.totalorder %s131_s7, %s131_s7 }
  0x1d   :  { %p138_p0 = por %p137_p13, %p136_p12 }
  0x1f   :  { %p139_p1 = pnand %p138_p0, %p132_p11 }
  0x21   :  { %142 = shalt.err (!%p139_p1)
}
  0x22   :  { %20 = dma.hbm_to_vmem [thread:$0]  %s266_s0, 128, %s18_s15, [#allocation3]  }
  0x23   :  { %s195_s9 = smov [#allocation7]   ;;  %s143_s13 = scalar_lea.hbm %s268_s2, 128 }
  0x24   :  { %s37_s10 = sshll.u32 %s195_s9, 4  ;;  %p144_p2 = scmp.ne.s32.totalorder %s268_s2, %s143_s13  ;;  %s38_s10 = int_to_ptr.vmem [resolvable:$true] %s37_s10 }
  0x25   :  { %p147_p3 = scmp.lt.u32.totalorder %s143_s13, %s268_s2 }
  0x27   :  { %p149_p4 = pnand %p147_p3, %p144_p2 }
  0x29   :  { %152 = shalt.err (!%p149_p4)
}
  0x2a   :  { %s153_s19 = scalar_lea.vmem %s38_s10, 128  ;;  %p158_p6 = scmp.lt.s32.totalorder %s38_s10, %s38_s10 }
  0x2b   :  { %p154_p5 = scmp.ne.s32.totalorder %s38_s10, %s153_s19  ;;  %p159_p7 = scmp.lt.s32.totalorder %s153_s19, %s153_s19 }
  0x2d   :  { %p160_p8 = por %p159_p7, %p158_p6 }
  0x2f   :  { %p161_p9 = pnand %p160_p8, %p154_p5 }
  0x31   :  { %164 = shalt.err (!%p161_p9)
}
  0x32   :  { %40 = dma.hbm_to_vmem [thread:$0]  %s268_s2, 128, %s38_s10, [#allocation6]  }
  0x33   :  { %187 = dma.done.wait [#allocation3], 128  }
  0x34   :  { %188 = vsyncadd [#allocation3], 4294967168 }
  0x35   :  { %189 = dma.done.wait [#allocation6], 144  }
  0x36   :  { %190 = vsyncadd [#allocation6], 4294967152  ;;  %v196_v0 = vmov 0   ;;  %v59_v1 = vld [vmem:[#allocation7] sm:$0xff]  ;;  %v91_v3 = vld [vmem:[#allocation5] ss:$0 sm:$0xff] }
  0x37   :  { %98 = vset.pattern.permute.xlu0 %v196_v0  ;;  %v92_v2 = vadd.f32 -1.0, %v59_v1  ;;  %v51_v4 = vld [vmem:[#allocation2] sm:$0xff]  ;;  %s197_s20 = smov [#allocation8]  }
  0x38   :  { %v58_v6 = vsub.f32 %v91_v3, %v51_v4  ;;  %s81_s21 = sshll.u32 %s197_s20, 4  ;;  %s82_s21 = int_to_ptr.vmem [resolvable:$true] %s81_s21 }
  0x39   :  { %63 = vperm.xlu0 %98, %v92_v2   ;;  %s165_s2 = scalar_lea.vmem %s82_s21, 128  ;;  %p170_p11 = scmp.lt.s32.totalorder %s82_s21, %s82_s21 }
  0x3a   :  { %p166_p10 = scmp.ne.s32.totalorder %s82_s21, %s165_s2  ;;  %p171_p12 = scmp.lt.s32.totalorder %s165_s2, %s165_s2 }
  0x3c   :  { %p172_p13 = por %p171_p12, %p170_p11 }
  0x3d   :  { %69 = vperm.xlu0 %98, %v59_v1  }
  0x3e   :  { %p173_p0 = pnand %p172_p13, %p166_p10 }
  0xb8   :  { %v64_v5 = vpop.permute.xlu0 %63 }
  0xb9   :  { %v66_v8 = vmul.f32 %v64_v5, %v58_v6 }
  0xbc   :  { %v70_v7 = vpop.permute.xlu0 %69 }
  0xbd   :  { %v72_v9 = vmul.f32 %v70_v7, %v58_v6 }
  0xbf   :  { %v73_v10 = vmax.f32 %v66_v8, %v72_v9 }
  0xc1   :  { %74 = vst [vmem:[#allocation8] sm:$0xff] %v73_v10 }
  0xc2   :  { %176 = shalt.err (!%p173_p0)
}
  0xc3   :  { %s177_s24 = scalar_lea.hbm %s269_s3, 128 }
  0xc4   :  { %p178_p1 = scmp.ne.s32.totalorder %s269_s3, %s177_s24  ;;  %p181_p2 = scmp.lt.u32.totalorder %s177_s24, %s269_s3 }
  0xc6   :  { %p183_p3 = pnand %p181_p2, %p178_p1 }
  0xc8   :  { %186 = shalt.err (!%p183_p3)
}
  0xc9   :  { %84 = dma.vmem_to_hbm [thread:$0]  %s82_s21, 128, %s269_s3, [#allocation4]  }
  0xca   :  { %191 = dma.done.wait [#allocation4], 128  }
  0xcb   :  { %192 = vsyncadd [#allocation4], 4294967168 }
  0xcc   :  { %88 = vsyncpa [#allocation3], 1 }
  0xcd   :  { %89 = vsyncpa [#allocation6], 1 }
  0xce   :  { %90 = vsyncpa [#allocation4], 1 }

</bundles_post_ra>
